<compile_context>
chip_gen: v5e
topology: v5e:2x2
jax: 0.10.0
libtpu: 0.0.40
codegen_flags: <defaults>
</compile_context>

<pallas_src>
import jax
import jax.numpy as jnp
from jax.experimental import pallas as pl
from jax.experimental.pallas import tpu as pltpu


def _leaky_relu(v, slope=0.2):
    return jnp.where(v > 0, v, slope * v)


def ltransform_kernel(x_ref, z_ref, w1_ref, w2_ref, wz_ref, bz_ref,
                      w3_ref, w4_ref, w5_ref, o_ref):
    """One lane-dense batch tile of the full forward pass.

    Activations are feature-major (features, tm) with the batch tile on the
    128-lane axis; weights are PyTorch (out_features, in_features) layout so
    every layer is a plain W @ h with no in-kernel transposes.  All dot
    operands are bf16 (native MXU input precision) with f32 accumulation;
    elementwise math runs in f32 (safe on v5e, which has no bf16 VPU/EUP).
    """

    def bdot(w_ref, h):
        # bf16 x bf16 -> f32 accumulate on the MXU.
        return jnp.dot(w_ref[...], h.astype(jnp.bfloat16),
                       preferred_element_type=jnp.float32)

    x = x_ref[...]                                       # (R, tm)   bf16
    z = z_ref[...]                                       # (Z, tm)   bf16

    h = _leaky_relu(jnp.dot(w1_ref[...], x,
                            preferred_element_type=jnp.float32))   # (R/2, tm) f32
    h = _leaky_relu(bdot(w2_ref, h))                                # (R/4, tm)

    # Sub_Adder (product layer): h * tanh(Wz @ z + bz)
    gate = jnp.tanh(jnp.dot(wz_ref[...], z, preferred_element_type=jnp.float32)
                    + bz_ref[...].astype(jnp.float32))              # (R/4, tm)
    h = h * gate

    h = _leaky_relu(bdot(w3_ref, h))                                # (R/2, tm)
    h = _leaky_relu(bdot(w4_ref, h))                                # (R,   tm)
    o_ref[...] = bdot(w5_ref, h).astype(o_ref.dtype)                # (R,   tm)


def ltransform_generator_t(x_t, z_t, params, *, tm=8192, out_dtype=jnp.bfloat16):
    """Feature-major production entry point.

    x_t: (nROI, B) bf16, z_t: (nCluster+nLatent, B) bf16 — batch on the last
    (lane) axis.  Returns (nROI, Bp) in `out_dtype`, where Bp is B rounded up
    to the batch tile; columns >= B are padding garbage and must be ignored
    by consumers.  Passing bf16 feature-major inputs (and a lane-aligned B)
    means this wrapper performs zero extra HBM passes around the kernel.
    """
    R, B = x_t.shape
    Z = z_t.shape[0]
    w1, w2, wz, bz, w3, w4, w5 = params
    Rh, Rq = w1.shape[0], w2.shape[0]

    # Keep the bf16 MXU contract even if a caller hands us f32.
    if x_t.dtype != jnp.bfloat16:
        x_t = x_t.astype(jnp.bfloat16)        # extra HBM pass; avoid by passing bf16
    if z_t.dtype != jnp.bfloat16:
        z_t = z_t.astype(jnp.bfloat16)
    params = tuple(p if p.dtype == jnp.bfloat16 else p.astype(jnp.bfloat16)
                   for p in params)
    w1, w2, wz, bz, w3, w4, w5 = params

    # ---- Tile selection: lane-dense, >= 2 grid steps when possible (v7x
    # megacore), per-tile working set within a 24 MiB budget (v7x: 64 MiB/TC).
    lane = 128
    Bp = pl.cdiv(B, lane) * lane
    n_blocks = Bp // lane
    w_bytes = sum(int(p.size) * p.dtype.itemsize for p in params)

    def vmem_bytes(tile):
        in_stream = 2 * tile * (R + Z) * 2      # double-buffered bf16 inputs
        out_stream = 2 * tile * R * 2           # double-buffered bf16 output
        temps = 16 * tile * R                   # generous f32 intermediate estimate
        return in_stream + out_stream + 2 * w_bytes + temps

    budget = 24 << 20
    k_cap = max(1, min(max(int(tm), lane) // lane, n_blocks))
    if n_blocks >= 2:
        k_cap = min(k_cap, n_blocks // 2)       # >= 2 steps -> both v7x TCs busy
    k = 1
    for d in range(1, k_cap + 1):
        if n_blocks % d == 0 and vmem_bytes(d * lane) <= budget:
            k = d
    tm = k * lane
    grid = (n_blocks // k,)

    # Pad batch only if needed (one small copy; skip it by passing aligned B).
    if Bp != B:
        x_t = jnp.pad(x_t, ((0, 0), (0, Bp - B)))
        z_t = jnp.pad(z_t, ((0, 0), (0, Bp - B)))

    # Explicit VMEM budget (capped below v7x's 64 MiB physical per-TC VMEM).
    vmem_limit = int(min(48 << 20, max(3 * vmem_bytes(tm), 32 << 20)))

    # Constant-index weight blocks: loaded once, resident across the grid.
    def const(shape):
        return pl.BlockSpec(shape, lambda i: (0,) * len(shape))

    flops = 2 * Bp * (R * Rh + Rh * Rq + Z * Rq + Rq * Rh + Rh * R + R * R)
    bytes_accessed = (Bp * (R + Z) * 2 + w_bytes
                      + Bp * R * jnp.dtype(out_dtype).itemsize)
    cost = pl.CostEstimate(flops=flops, transcendentals=Bp * Rq,
                           bytes_accessed=int(bytes_accessed))

    return pl.pallas_call(
        ltransform_kernel,
        out_shape=jax.ShapeDtypeStruct((R, Bp), out_dtype),
        grid=grid,
        in_specs=[
            pl.BlockSpec((R, tm), lambda i: (0, i)),     # x^T tile
            pl.BlockSpec((Z, tm), lambda i: (0, i)),     # z^T tile
            const((Rh, R)),                              # W1
            const((Rq, Rh)),                             # W2
            const((Rq, Z)),                              # Wz
            const((Rq, 1)),                              # bz
            const((Rh, Rq)),                             # W3
            const((R, Rh)),                              # W4
            const((R, R)),                               # W5
        ],
        out_specs=pl.BlockSpec((R, tm), lambda i: (0, i)),
        compiler_params=pltpu.CompilerParams(
            dimension_semantics=("parallel",),           # shards across v7x TCs
            vmem_limit_bytes=vmem_limit),
        cost_estimate=cost,
    )(x_t, z_t, w1, w2, wz, bz, w3, w4, w5)


def ltransform_generator(x, z, params, *, tm=8192, out_dtype=jnp.bfloat16):
    """PyTorch-style batch-major compatibility wrapper: x (B, nROI), z (B, Z).

    NOTE: the transposes/casts/slice here are full extra HBM passes; prefer
    `ltransform_generator_t` with feature-major bf16 data in production.
    """
    B = x.shape[0]
    out_t = ltransform_generator_t(x.T.astype(jnp.bfloat16),
                                   z.T.astype(jnp.bfloat16),
                                   params, tm=tm, out_dtype=out_dtype)
    return out_t[:, :B].T


def init_params(key, nCluster, nLatent, nROI, dtype=jnp.bfloat16):
    """Deterministic synthetic weights, PyTorch nn.Linear layout (out, in)."""
    R, Rh, Rq, Z = nROI, nROI // 2, nROI // 4, nCluster + nLatent
    ks = jax.random.split(key, 7)

    def lin(k, out_f, in_f):
        bound = 1.0 / jnp.sqrt(in_f)
        return jax.random.uniform(k, (out_f, in_f), jnp.float32,
                                  -bound, bound).astype(dtype)

    w1 = lin(ks[0], Rh, R)
    w2 = lin(ks[1], Rq, Rh)
    wz = lin(ks[2], Rq, Z)
    bz = jax.random.uniform(ks[3], (Rq, 1), jnp.float32,
                            -1.0 / jnp.sqrt(Z), 1.0 / jnp.sqrt(Z)).astype(dtype)
    w3 = lin(ks[4], Rh, Rq)
    w4 = lin(ks[5], R, Rh)
    w5 = lin(ks[6], R, R)
    return (w1, w2, wz, bz, w3, w4, w5)


def reference_forward_matched(x, z, params):
    """Pure-JAX reference mirroring the kernel's precision contract:
    bf16 matmul operands, f32 accumulation, f32 elementwise math."""
    w1, w2, wz, bz, w3, w4, w5 = params                  # bf16 weights

    def mm(h_f32, w):
        return jnp.dot(h_f32.astype(jnp.bfloat16), w.T,
                       preferred_element_type=jnp.float32)

    xb = x.astype(jnp.bfloat16)
    zb = z.astype(jnp.bfloat16)
    h = jax.nn.leaky_relu(jnp.dot(xb, w1.T, preferred_element_type=jnp.float32), 0.2)
    h = jax.nn.leaky_relu(mm(h, w2), 0.2)
    gate = jnp.tanh(jnp.dot(zb, wz.T, preferred_element_type=jnp.float32)
                    + bz.T.astype(jnp.float32))
    h = h * gate
    h = jax.nn.leaky_relu(mm(h, w3), 0.2)
    h = jax.nn.leaky_relu(mm(h, w4), 0.2)
    return mm(h, w5)


def reference_forward_f32(x, z, params):
    """Module-faithful f32 reference (weights upcast from their bf16 storage)."""
    w1, w2, wz, bz, w3, w4, w5 = [p.astype(jnp.float32) for p in params]
    h = jax.nn.leaky_relu(x @ w1.T, 0.2)
    h = jax.nn.leaky_relu(h @ w2.T, 0.2)
    h = h * jnp.tanh(z @ wz.T + bz.T)
    h = jax.nn.leaky_relu(h @ w3.T, 0.2)
    h = jax.nn.leaky_relu(h @ w4.T, 0.2)
    return h @ w5.T


if __name__ == "__main__":
    nCluster, nLatent, nROI = 3, 5, 32      # Z = 8, R/2 = 16, R/4 = 8
    B = 300                                 # not lane-aligned: exercises padding

    key = jax.random.PRNGKey(0)
    kx, kz, kp = jax.random.split(key, 3)
    x = jax.random.normal(kx, (B, nROI), jnp.float32)
    z = jax.random.normal(kz, (B, nCluster + nLatent), jnp.float32)
    params = init_params(kp, nCluster, nLatent, nROI)

    # Production calling convention: feature-major bf16 (batch on the lane
    # axis).  Built once here as test setup; a real pipeline keeps activations
    # in this layout so the kernel wrapper adds zero extra HBM passes.
    x_t = x.T.astype(jnp.bfloat16)          # (nROI, B)
    z_t = z.T.astype(jnp.bfloat16)          # (Z,    B)

    out_t = ltransform_generator_t(x_t, z_t, params)     # (nROI, Bp)
    out_t = jax.block_until_ready(out_t)
    assert out_t.shape[0] == nROI and out_t.shape[1] >= B

    out = out_t[:, :B].T.astype(jnp.float32)             # test-side slice only

    ref_m = reference_forward_matched(x, z, params)
    err_m = float(jnp.max(jnp.abs(out - ref_m)))
    assert jnp.allclose(out, ref_m, atol=2e-2, rtol=2e-2), (
        f"mismatch vs matched-precision reference (max abs err {err_m})")

    ref_f = reference_forward_f32(x, z, params)
    err_f = float(jnp.max(jnp.abs(out - ref_f)))
    assert jnp.allclose(out, ref_f, atol=2.5e-1, rtol=1e-1), (
        f"mismatch vs f32 reference (max abs err {err_f})")

    # Batch-major PyTorch-style wrapper (compatibility path).
    out_bm = jax.block_until_ready(ltransform_generator(x, z, params))
    assert out_bm.shape == (B, nROI)
    assert jnp.allclose(out_bm.astype(jnp.float32), out, atol=1e-3, rtol=1e-3)

    print("KERNEL_OK")
</pallas_src>

<mosaic_0001>
module attributes {stable_mosaic.version = 11 : i64} {
  func.func @ltransform_kernel(%arg0: i32, %arg1: memref<32x128xbf16, #tpu.memory_space<vmem>>, %arg2: memref<8x128xbf16, #tpu.memory_space<vmem>>, %arg3: memref<16x32xbf16, #tpu.memory_space<vmem>>, %arg4: memref<8x16xbf16, #tpu.memory_space<vmem>>, %arg5: memref<8x8xbf16, #tpu.memory_space<vmem>>, %arg6: memref<8x1xbf16, #tpu.memory_space<vmem>>, %arg7: memref<16x8xbf16, #tpu.memory_space<vmem>>, %arg8: memref<32x16xbf16, #tpu.memory_space<vmem>>, %arg9: memref<32x32xbf16, #tpu.memory_space<vmem>>, %arg10: memref<32x128xbf16, #tpu.memory_space<vmem>>) attributes {dimension_semantics = [#tpu.dimension_semantics<parallel>], iteration_bounds = array<i64: 3>, scalar_prefetch = 0 : i64, scratch_operands = 0 : i64, tpu.core_type = #tpu.core_type<tc>, window_params = [{transform_indices = @transform_0, window_bounds = array<i64: 32, 128>}, {transform_indices = @transform_1, window_bounds = array<i64: 8, 128>}, {pipeline_mode = #tpu.pipeline_mode<synchronous>, transform_indices = @transform_2, window_bounds = array<i64: 16, 32>}, {pipeline_mode = #tpu.pipeline_mode<synchronous>, transform_indices = @transform_3, window_bounds = array<i64: 8, 16>}, {pipeline_mode = #tpu.pipeline_mode<synchronous>, transform_indices = @transform_4, window_bounds = array<i64: 8, 8>}, {pipeline_mode = #tpu.pipeline_mode<synchronous>, transform_indices = @transform_5, window_bounds = array<i64: 8, 1>}, {pipeline_mode = #tpu.pipeline_mode<synchronous>, transform_indices = @transform_6, window_bounds = array<i64: 16, 8>}, {pipeline_mode = #tpu.pipeline_mode<synchronous>, transform_indices = @transform_7, window_bounds = array<i64: 32, 16>}, {pipeline_mode = #tpu.pipeline_mode<synchronous>, transform_indices = @transform_8, window_bounds = array<i64: 32, 32>}, {transform_indices = @transform_9, window_bounds = array<i64: 32, 128>}]} {
    %c0 = arith.constant 0 : index
    %c0_0 = arith.constant 0 : index
    %0 = vector.load %arg1[%c0, %c0_0] : memref<32x128xbf16, #tpu.memory_space<vmem>>, vector<32x128xbf16>
    %c0_1 = arith.constant 0 : index
    %c0_2 = arith.constant 0 : index
    %1 = vector.load %arg2[%c0_1, %c0_2] : memref<8x128xbf16, #tpu.memory_space<vmem>>, vector<8x128xbf16>
    %c0_3 = arith.constant 0 : index
    %c0_4 = arith.constant 0 : index
    %2 = vector.load %arg3[%c0_3, %c0_4] : memref<16x32xbf16, #tpu.memory_space<vmem>>, vector<16x32xbf16>
    %cst = arith.constant dense<0.000000e+00> : vector<16x128xf32>
    %3 = tpu.matmul %2, %0, %cst {dimension_numbers = #tpu.dot_dimension_numbers<[1], [0], [0], [1], [0, 0, 1, 1], [], []>} : vector<16x32xbf16>, vector<32x128xbf16>, vector<16x128xf32> -> vector<16x128xf32>
    %cst_5 = arith.constant 0.000000e+00 : f32
    %4 = vector.broadcast %cst_5 : f32 to vector<16x128xf32>
    %5 = arith.cmpf ogt, %3, %4 : vector<16x128xf32>
    %cst_6 = arith.constant 2.000000e-01 : f32
    %6 = vector.broadcast %cst_6 : f32 to vector<16x128xf32>
    %7 = arith.mulf %6, %3 : vector<16x128xf32>
    %8 = arith.select %5, %3, %7 : vector<16x128xi1>, vector<16x128xf32>
    %c0_7 = arith.constant 0 : index
    %c0_8 = arith.constant 0 : index
    %9 = vector.load %arg4[%c0_7, %c0_8] : memref<8x16xbf16, #tpu.memory_space<vmem>>, vector<8x16xbf16>
    %10 = arith.truncf %8 : vector<16x128xf32> to vector<16x128xbf16>
    %cst_9 = arith.constant dense<0.000000e+00> : vector<8x128xf32>
    %11 = tpu.matmul %9, %10, %cst_9 {dimension_numbers = #tpu.dot_dimension_numbers<[1], [0], [0], [1], [0, 0, 1, 1], [], []>} : vector<8x16xbf16>, vector<16x128xbf16>, vector<8x128xf32> -> vector<8x128xf32>
    %cst_10 = arith.constant 0.000000e+00 : f32
    %12 = vector.broadcast %cst_10 : f32 to vector<8x128xf32>
    %13 = arith.cmpf ogt, %11, %12 : vector<8x128xf32>
    %cst_11 = arith.constant 2.000000e-01 : f32
    %14 = vector.broadcast %cst_11 : f32 to vector<8x128xf32>
    %15 = arith.mulf %14, %11 : vector<8x128xf32>
    %16 = arith.select %13, %11, %15 : vector<8x128xi1>, vector<8x128xf32>
    %c0_12 = arith.constant 0 : index
    %c0_13 = arith.constant 0 : index
    %17 = vector.load %arg5[%c0_12, %c0_13] : memref<8x8xbf16, #tpu.memory_space<vmem>>, vector<8x8xbf16>
    %cst_14 = arith.constant dense<0.000000e+00> : vector<8x128xf32>
    %18 = tpu.matmul %17, %1, %cst_14 {dimension_numbers = #tpu.dot_dimension_numbers<[1], [0], [0], [1], [0, 0, 1, 1], [], []>} : vector<8x8xbf16>, vector<8x128xbf16>, vector<8x128xf32> -> vector<8x128xf32>
    %c0_15 = arith.constant 0 : index
    %c0_16 = arith.constant 0 : index
    %19 = vector.load %arg6[%c0_15, %c0_16] : memref<8x1xbf16, #tpu.memory_space<vmem>>, vector<8x1xbf16>
    %20 = arith.extf %19 : vector<8x1xbf16> to vector<8x1xf32>
    %21 = vector.broadcast %20 : vector<8x1xf32> to vector<8x128xf32>
    %22 = arith.addf %18, %21 : vector<8x128xf32>
    %23 = math.tanh %22 : vector<8x128xf32>
    %24 = arith.mulf %16, %23 : vector<8x128xf32>
    %c0_17 = arith.constant 0 : index
    %c0_18 = arith.constant 0 : index
    %25 = vector.load %arg7[%c0_17, %c0_18] : memref<16x8xbf16, #tpu.memory_space<vmem>>, vector<16x8xbf16>
    %26 = arith.truncf %24 : vector<8x128xf32> to vector<8x128xbf16>
    %cst_19 = arith.constant dense<0.000000e+00> : vector<16x128xf32>
    %27 = tpu.matmul %25, %26, %cst_19 {dimension_numbers = #tpu.dot_dimension_numbers<[1], [0], [0], [1], [0, 0, 1, 1], [], []>} : vector<16x8xbf16>, vector<8x128xbf16>, vector<16x128xf32> -> vector<16x128xf32>
    %cst_20 = arith.constant 0.000000e+00 : f32
    %28 = vector.broadcast %cst_20 : f32 to vector<16x128xf32>
    %29 = arith.cmpf ogt, %27, %28 : vector<16x128xf32>
    %cst_21 = arith.constant 2.000000e-01 : f32
    %30 = vector.broadcast %cst_21 : f32 to vector<16x128xf32>
    %31 = arith.mulf %30, %27 : vector<16x128xf32>
    %32 = arith.select %29, %27, %31 : vector<16x128xi1>, vector<16x128xf32>
    %c0_22 = arith.constant 0 : index
    %c0_23 = arith.constant 0 : index
    %33 = vector.load %arg8[%c0_22, %c0_23] : memref<32x16xbf16, #tpu.memory_space<vmem>>, vector<32x16xbf16>
    %34 = arith.truncf %32 : vector<16x128xf32> to vector<16x128xbf16>
    %cst_24 = arith.constant dense<0.000000e+00> : vector<32x128xf32>
    %35 = tpu.matmul %33, %34, %cst_24 {dimension_numbers = #tpu.dot_dimension_numbers<[1], [0], [0], [1], [0, 0, 1, 1], [], []>} : vector<32x16xbf16>, vector<16x128xbf16>, vector<32x128xf32> -> vector<32x128xf32>
    %cst_25 = arith.constant 0.000000e+00 : f32
    %36 = vector.broadcast %cst_25 : f32 to vector<32x128xf32>
    %37 = arith.cmpf ogt, %35, %36 : vector<32x128xf32>
    %cst_26 = arith.constant 2.000000e-01 : f32
    %38 = vector.broadcast %cst_26 : f32 to vector<32x128xf32>
    %39 = arith.mulf %38, %35 : vector<32x128xf32>
    %40 = arith.select %37, %35, %39 : vector<32x128xi1>, vector<32x128xf32>
    %c0_27 = arith.constant 0 : index
    %c0_28 = arith.constant 0 : index
    %41 = vector.load %arg9[%c0_27, %c0_28] : memref<32x32xbf16, #tpu.memory_space<vmem>>, vector<32x32xbf16>
    %42 = arith.truncf %40 : vector<32x128xf32> to vector<32x128xbf16>
    %cst_29 = arith.constant dense<0.000000e+00> : vector<32x128xf32>
    %43 = tpu.matmul %41, %42, %cst_29 {dimension_numbers = #tpu.dot_dimension_numbers<[1], [0], [0], [1], [0, 0, 1, 1], [], []>} : vector<32x32xbf16>, vector<32x128xbf16>, vector<32x128xf32> -> vector<32x128xf32>
    %44 = arith.truncf %43 : vector<32x128xf32> to vector<32x128xbf16>
    %c0_30 = arith.constant 0 : index
    %c0_31 = arith.constant 0 : index
    %45 = vector.load %arg10[%c0_30, %c0_31] : memref<32x128xbf16, #tpu.memory_space<vmem>>, vector<32x128xbf16>
    tpu.vector_store %arg10[%c0_30, %c0_31], %44 {strides = array<i32>} : memref<32x128xbf16, #tpu.memory_space<vmem>>, vector<32x128xbf16>,
    return
  }
  func.func @transform_0(%arg0: i32) -> (i32, i32) {
    %c0_i32 = arith.constant 0 : i32
    %c0_i32_0 = arith.constant 0 : i32
    return %c0_i32, %arg0 : i32, i32
  }
  func.func @transform_1(%arg0: i32) -> (i32, i32) {
    %c0_i32 = arith.constant 0 : i32
    %c0_i32_0 = arith.constant 0 : i32
    return %c0_i32, %arg0 : i32, i32
  }
  func.func @transform_2(%arg0: i32) -> (i32, i32) {
    %c0_i32 = arith.constant 0 : i32
    %c0_i32_0 = arith.constant 0 : i32
    %c0_i32_1 = arith.constant 0 : i32
    return %c0_i32, %c0_i32_0 : i32, i32
  }
  func.func @transform_3(%arg0: i32) -> (i32, i32) {
    %c0_i32 = arith.constant 0 : i32
    %c0_i32_0 = arith.constant 0 : i32
    %c0_i32_1 = arith.constant 0 : i32
    return %c0_i32, %c0_i32_0 : i32, i32
  }
  func.func @transform_4(%arg0: i32) -> (i32, i32) {
    %c0_i32 = arith.constant 0 : i32
    %c0_i32_0 = arith.constant 0 : i32
    %c0_i32_1 = arith.constant 0 : i32
    return %c0_i32, %c0_i32_0 : i32, i32
  }
  func.func @transform_5(%arg0: i32) -> (i32, i32) {
    %c0_i32 = arith.constant 0 : i32
    %c0_i32_0 = arith.constant 0 : i32
    %c0_i32_1 = arith.constant 0 : i32
    return %c0_i32, %c0_i32_0 : i32, i32
  }
  func.func @transform_6(%arg0: i32) -> (i32, i32) {
    %c0_i32 = arith.constant 0 : i32
    %c0_i32_0 = arith.constant 0 : i32
    %c0_i32_1 = arith.constant 0 : i32
    return %c0_i32, %c0_i32_0 : i32, i32
  }
  func.func @transform_7(%arg0: i32) -> (i32, i32) {
    %c0_i32 = arith.constant 0 : i32
    %c0_i32_0 = arith.constant 0 : i32
    %c0_i32_1 = arith.constant 0 : i32
    return %c0_i32, %c0_i32_0 : i32, i32
  }
  func.func @transform_8(%arg0: i32) -> (i32, i32) {
    %c0_i32 = arith.constant 0 : i32
    %c0_i32_0 = arith.constant 0 : i32
    %c0_i32_1 = arith.constant 0 : i32
    return %c0_i32, %c0_i32_0 : i32, i32
  }
  func.func @transform_9(%arg0: i32) -> (i32, i32) {
    %c0_i32 = arith.constant 0 : i32
    %c0_i32_0 = arith.constant 0 : i32
    return %c0_i32, %arg0 : i32, i32
  }
}

</mosaic_0001>

<bundles_post_ra>
// kernel: tpu_custom_call.1
= control target key start
LH: loop header
LB: loop body
LE: loop exit
PB: predicated region body
PF: predicated region fallthrough
CT: control target
= control target key end

     0   :  { %s1250_s0 = inlined_call_operand.hbm [shape: bf16[32,384], index: 0, kind: input, shape index: {}]   ;;  %s1251_s1 = inlined_call_operand.vmem [shape: bf16[8,384], index: 1, kind: input, shape index: {}]   ;;  %s1252_s2 = inlined_call_operand.hbm [shape: bf16[16,32], index: 2, kind: input, shape index: {}]   ;;  %s1253_s3 = inlined_call_operand.vmem [shape: bf16[8,16], index: 3, kind: input, shape index: {}]   ;;  %s1254_s4 = inlined_call_operand.vmem [shape: bf16[8,8], index: 4, kind: input, shape index: {}]   ;;  %s1255_s5 = inlined_call_operand.vmem [shape: bf16[8,1], index: 5, kind: input, shape index: {}]   ;;  %s1256_s6 = inlined_call_operand.vmem [shape: bf16[16,8], index: 6, kind: input, shape index: {}]   ;;  %s1257_s7 = inlined_call_operand.vmem [shape: bf16[32,16], index: 7, kind: input, shape index: {}]   ;;  %s1258_s8 = inlined_call_operand.vmem [shape: bf16[32,32], index: 8, kind: input, shape index: {}]   ;;  %s1259_s9 = inlined_call_operand.hbm [shape: bf16[32,384], index: 9, kind: output, shape index: {}]  }
   0x1   :  { %1265 = sst [smem:[#allocation14_spill]] %s1252_s2 }
   0x2   :  { %14 = vsyncpa [#allocation3], 0 }
   0x3   :  { %16 = vsyncpa [#allocation3 + $0x1], 0 }
   0x4   :  { %17 = vsyncpa [#allocation6], 0 }
   0x5   :  { %18 = vsyncpa [#allocation4], 0 }
   0x6   :  { %20 = vsyncpa [#allocation4 + $0x1], 0  ;;  %s1064_s30 = smov 0   ;;  %s1066_s10 = smov 0  }
   0x7   :  { %s1068_s11 = smov 0   ;;  %s1070_s12 = smov 0  }
   0x8 LB: > { %1266 = sst [smem:[#allocation11_spill]] %s1000_s11  ;;  %s1085_s13 = sadd.s32 4294967295, %s1004_s12   ;;  %s1004_s12 = sphi %s1070_s12, %s1277_s12   ;;  %s1000_s11 = sphi %s1068_s11, %s1279_s11   ;;  %s996_s10 = sphi %s1066_s10, %s1281_s10   ;;  %s992_s30 = sphi %s1064_s30, %s1280_s30  }
   0x9   : > { %s733_s14 = sadd.s32 4294967294, %s1004_s12   ;;  %p46_p0 = scmp.ne.s32.totalorder %s996_s10, %s992_s30 }
   0xa   : > { %p47_p1 = scmp.eq.s32.totalorder %s1085_s13, 0  ;;  %p243_p2 = scmp.eq.s32.totalorder %s1085_s13, 2 }
   0xb   : > { %p249_p3 = scmp.eq.s32.totalorder %s733_s14, 2  ;;  %p734_p5 = scmp.ge.s32.totalorder %s1004_s12, 1 }
   0xc   : > { %p1094_p4 = por %p47_p1, %p46_p0  ;;  %p256_p7 = scmp.lt.s32.totalorder %s1004_s12, 4 }
   0xd   : > { %p1099_p6 = por %p249_p3, %p46_p0  ;;  %s1269_s2 = sld [smem:[#allocation14_spill]] }
   0xe   : > { %p1107_p8 = pnand %p734_p5, %p256_p7  ;;  %s1006_s21 = smov [#allocation5]  }
   0xf   : > { %s269_s22 = sshll.u32 %s1006_s21, 4  ;;  %s1116_s23 = sadd.s32 1, %s1004_s12   ;;  %s270_s22 = int_to_ptr.vmem [resolvable:$true] %s269_s22 }
  0x10   : > { %p815_p9 = pneg %p1107_p8  ;;  %1271 = sst [smem:[#allocation12_spill]] %s1116_s23 }
  0x11   : > { %s1260_s24 = smov 64   ;;  %s1261_s25 = smov 4  }
  0x12   : > { %p816_p10 = pnand %p815_p9, %p47_p1  ;;  %s30_s26 = ssub.s32 %s1004_s12, %s1116_s23 }
  0x13   : > { %s267_s19 = sshll.u32 %s1269_s2, 4  ;;  %s33_s27 = sadd.s32 1, %s1000_s11  ;;  %s268_s19 = int_to_ptr.hbm [resolvable:$true] %s267_s19 }
  0x14   : > { %818 = dma.hbm_to_vmem [thread:$0]  (!%p816_p10), %s268_s19, 128, %s270_s22, [#allocation6], %s1260_s24, %s1260_s24, %s1261_s25  }
  0x15   : > { %p31_p11 = scmp.eq.s32.totalorder %s30_s26, 0  ;;  %p40_p12 = scmp.ne.s32.totalorder %s1000_s11, %s996_s10 }
  0x16   : > { %p41_p13 = scmp.eq.s32.totalorder %s1004_s12, 0  ;;  %p828_p0 = scmp.lt.s32.totalorder %s1004_s12, 3 }
  0x17   : > { %s1129_s28 = scalar_select %p31_p11, %s1000_s11, %s33_s27  }
  0x18   : > { %p42_p3 = por %p41_p13, %p40_p12  ;;  %p1133_p5 = por %p243_p2, %p40_p12 }
  0x19   : > { %1272 = sst [smem:[#allocation13_spill]] %s1129_s28  ;;  %s301_s14 = sand.u32 1, %s1000_s11  }
  0x1a   : > { %s738_s17 = sshll.u32 %s1004_s12, 2  ;;  %s737_s18 = sshll.u32 %s301_s14, 4 }
  0x1b   : > { %s309_s22 = scalar_lea.hbm %s1250_s0, %s738_s17  ;;  %s305_s24 = scalar_lea.vmem [#allocation2], %s737_s18 }
  0x1c   : > { %s310_s26 = sshll.u32 %s309_s22, 4  ;;  %s312_s25 = sshll.u32 %s305_s24, 4  ;;  %s311_s26 = int_to_ptr.hbm [resolvable:$true] %s310_s26  ;;  %s313_s25 = int_to_ptr.vmem [resolvable:$true] %s312_s25 }
  0x1d   : > { %p1144_p7 = pnand %p828_p0, %p42_p3  ;;  %s302_s2 = scalar_lea.sflag [#allocation3], %s301_s14 }
  0x1e   : > { %s904_s28 = sshra.s32 %s311_s26, 4  ;;  %s911_s24 = scalar_lea.hbm %s1250_s0, 48  ;;  %s905_s28 = int_to_ptr.hbm [resolvable:$true] %s904_s28 }
  0x1f   : > { %s906_s11 = scalar_lea.hbm %s905_s28, 16  ;;  %p908_p9 = pneg %p1144_p7 }
  0x20   : > { %p907_p2 = scmp.ne.s32.totalorder %s905_s28, %s906_s11  ;;  %p912_p12 = scmp.lt.s32.totalorder %s905_s28, %s1250_s0 }
  0x21   : > { %p913_p13 = scmp.lt.s32.totalorder %s911_s24, %s906_s11 }
  0x22   : > { %p909_p10 = pnand %p908_p9, %p907_p2 }
  0x23   : > { %p914_p0 = por %p913_p13, %p912_p12 }
  0x24   : > { %p910_p11 = pneg %p909_p10 }
  0x26   : > { %p915_p3 = pnand %p914_p0, %p910_p11 }
  0x28   : > { %918 = shalt.err (!%p915_p3)
}
  0x29   : > { %s1009_s14 = smov 192   ;;  %s1275_s22 = smov 4  }
  0x2a   : > { %s1276_s23 = smov 64   ;;  %331 = sbr.rel (%p1107_p8) target bundleno = 816 (0x330), region = 56 }
  0x2b   : > { %822 = dma.hbm_to_vmem [thread:$0]  (!%p1144_p7), %s311_s26, 256, %s313_s25, %s302_s2, %s1009_s14, %s1276_s23, %s1275_s22  }
  0x2c   : > { %s1163_s17 = sand.u32 (!%p1107_p8), 1, %s996_s10  }
  0x2d   : > { %s740_s11 = sshll.u32 (!%p1107_p8), %s1163_s17, 4  ;;  %s334_s28 = scalar_lea.sflag (!%p1107_p8), [#allocation3], %s1163_s17 }
  0x2e   : > { %s337_s18 = scalar_lea.vmem (!%p1107_p8), [#allocation2], %s740_s11 }
  0x2f   : > { %979 = dma.done.wait (%p1094_p4), %s334_s28, 256  }
  0x30   : > { %981 = vsyncadd (%p1094_p4), %s334_s28, 4294967040 }
  0x31   : > { %983 = dma.done.wait (%p47_p1), [#allocation6], 128  }
  0x32   : > { %985 = vsyncadd (%p47_p1), [#allocation6], 4294967168  ;;  %v789_v0 = vld [vmem:[%s337_s18 + $0x8] sm:$0xff]  ;;  %v788_v1 = vld [vmem:[%s337_s18] sm:$0xff]  ;;  %vm411_vm0 = vcmask 261120   ;;  %p382_p8 = scmp.lt.s32.totalorder %s1085_s13, 2 }
  0x33   : > { %421 = vmatpush.bf16.msra.mxu0 %v789_v0  ;;  %v790_v2 = vld [vmem:[#allocation5] sm:$0xff]  ;;  %vm469_vm1 = vcmask 1043456   ;;  %vm465_vm2 = vcmask 64512   ;;  %v1010_v7 = vmov 0   ;;  %vm437_vm5 = vcmask 130048   ;;  %v793_v38 = vld [vmem:[%s1257_s7 + $0x8] sm:$0xff] }
  0x34   : > { %s383_s2 = scalar_select %p382_p8, %s1085_s13, 2  ;;  %v457_v5 = vld [vmem:[%s1254_s4] sm:$0xf]  ;;  %871 = vset.pattern.permute.xlu0 %v1010_v7  ;;  %v795_v54 = vld [vmem:[%s1258_s8 + $0x8] sm:$0xff] }
  0x35   : > { %v458_v6 = vld [vmem:[%s1255_s5] sm:$0xf]  ;;  %s381_s24 = scalar_lea.vmem [#allocation7], %s740_s11  ;;  %s785_s21 = sshll.u32 %s1085_s13, 2 }
  0x36   : > { %s743_s15 = sshll.u32 %s383_s2, 2  ;;  %v459_v8 = vunpack.c.l.bf16 %v458_v6  ;;  %v435_v16 = vld [vmem:[%s1253_s3] sm:$0xf]  ;;  %s634_s22 = scalar_lea.hbm %s1259_s9, %s785_s21 }
  0x37   : > { %422 = vmatpush.bf16.msra.mxu0 %v788_v1  ;;  %s385_s25 = scalar_lea.vmem %s1251_s1, %s743_s15  ;;  %v791_v29 = vld [vmem:[%s1256_s6] sm:$0xff]  ;;  %s635_s28 = sshll.u32 %s381_s24, 4  ;;  %s636_s28 = int_to_ptr.vmem [resolvable:$true] %s635_s28 }
  0x38   : > { %v391_v3 = vld [vmem:[%s385_s25] sm:$0xf]  ;;  %462 = vperm.xlu0 %871, %v459_v8   ;;  %s637_s18 = sshll.u32 %s634_s22, 4  ;;  %s624_s2 = scalar_lea.sflag [#allocation4], %s1163_s17  ;;  %s638_s18 = int_to_ptr.hbm [resolvable:$true] %s637_s18 }
  0x39   : > { %v471_v4 = vsel %vm469_vm1, %v391_v3, 0  ;;  %v792_v37 = vld [vmem:[%s1257_s7] sm:$0xff]  ;;  %s948_s15 = sshra.s32 %s638_s18, 4  ;;  %s954_s23 = scalar_lea.hbm %s1259_s9, 48  ;;  %s949_s15 = int_to_ptr.hbm [resolvable:$true] %s948_s15 }
  0x3a   : > { %756 = vmatmul.msk.bf16.vlgmr.msra.gmra.mxu0 %vm411_vm0, %v790_v2  ;;  %v794_v53 = vld [vmem:[%s1258_s8] sm:$0xff]  ;;  %s950_s20 = scalar_lea.hbm %s949_s15, 16  ;;  %p955_p2 = scmp.lt.s32.totalorder %s949_s15, %s1259_s9 }
  0x3b   : > { %480 = vmatpush.bf16.msrb.mxu0 %v471_v4  ;;  %p951_p1 = scmp.ne.s32.totalorder %s949_s15, %s950_s20  ;;  %p956_p9 = scmp.lt.s32.totalorder %s954_s23, %s950_s20 }
  0x3d   : > { %p952_p4 = pnand %p951_p1, %p1133_p5  ;;  %p957_p10 = por %p956_p9, %p955_p2 }
  0x3f   : > { %p953_p7 = pneg %p952_p4 }
  0x41   : > { %p958_p11 = pnand %p957_p10, %p953_p7 }
  0x4a   : > { %758 = vmatmul.msk.bf16.vlgmr.msrb.gmra.mxu0 %vm465_vm2, %v457_v5 }
  0xaa   : > { %v463_v19 = vpop.permute.xlu0 %462 }
  0xb7   : > { %v424_v9 = vpop.f32.mrf.mxu0 }
  0xb8   : > { %v431_v10 = vmul.f32 0.2, %v424_v9  ;;  %vm429_vm3 = vcmp.gt.f32.partialorder %v424_v9, 0.0 }
  0xba   : > { %v433_v13 = vsel %vm429_vm3, %v424_v9, %v431_v10 }
  0xbf   : > { %v426_v11 = vpop.f32.mrf.mxu0 }
  0xc0   : > { %v432_v12 = vmul.f32 0.2, %v426_v11  ;;  %vm430_vm4 = vcmp.gt.f32.partialorder %v426_v11, 0.0 }
  0xc2   : > { %v434_v14 = vsel %vm430_vm4, %v426_v11, %v432_v12 }
  0xc3   : > { %v436_v15 = vpack.c.bf16 %v434_v14, %v433_v13 }
  0xc5   : > { %448 = vmatpush.bf16.msra.mxu3 %v436_v15 }
  0xc7   : > { %v482_v17 = vpop.f32.mrf.mxu0 }
  0xc8   : > { %757 = vmatmul.msk.bf16.vlgmr.msra.gmra.mxu3 %vm437_vm5, %v435_v16  ;;  %v483_v20 = vadd.f32 %v482_v17, %v463_v19 }
  0xca   : > { %872 = vtanh.f32 %v483_v20 }
  0xcf   : > { %v484_v18 = vpop.f32.mrf.mxu0 }
  0xd0   : > { %v873_v22 = vpop.eup %872 }
 0x14b   : > { %v450_v21 = vpop.f32.mrf.mxu3 }
 0x14c   : > { %vm454_vm6 = vcmp.gt.f32.partialorder %v450_v21, 0.0  ;;  %v455_v23 = vmul.f32 0.2, %v450_v21 }
 0x14e   : > { %v456_v24 = vsel %vm454_vm6, %v450_v21, %v455_v23 }
 0x14f   : > { %v487_v25 = vmul.f32 %v873_v22, %v456_v24 }
 0x151   : > { %v490_v26 = vpack.c.bf16 %v487_v25, %v487_v25 }
 0x153   : > { %v452_v27 = vpop.f32.mrf.mxu3  ;;  %v500_v28 = vsel %vm469_vm1, %v490_v26, 0 }
 0x154   : > { %509 = vmatpush.bf16.msrb.mxu3 %v500_v28 }
 0x157   : > { %763 = vmatmul.msk.bf16.vlgmr.msrb.gmra.mxu3 %vm465_vm2, %v791_v29 }
 0x1da   : > { %v511_v30 = vpop.f32.mrf.mxu3 }
 0x1db   : > { %v518_v31 = vmul.f32 0.2, %v511_v30  ;;  %vm516_vm7 = vcmp.gt.f32.partialorder %v511_v30, 0.0 }
 0x1dd   : > { %v520_v34 = vsel %vm516_vm7, %v511_v30, %v518_v31 }
 0x1e2   : > { %v513_v32 = vpop.f32.mrf.mxu3 }
 0x1e3   : > { %vm517_vm8 = vcmp.gt.f32.partialorder %v513_v32, 0.0  ;;  %v519_v33 = vmul.f32 0.2, %v513_v32 }
 0x1e5   : > { %v521_v35 = vsel %vm517_vm8, %v513_v32, %v519_v33 }
 0x1e6   : > { %v526_v36 = vpack.c.bf16 %v521_v35, %v520_v34 }
 0x1e8   : > { %550 = vmatpush.bf16.msra.mxu1 %v526_v36 }
 0x1eb   : > { %772 = vmatmul.msk.bf16.vlgmr.msra.gmra.mxu1 %vm437_vm5, %v792_v37 }
 0x1fb   : > { %773 = vmatmul.msk.bf16.gmra.mxu1 %vm437_vm5, %v793_v38 }
 0x268   : > { %v552_v39 = vpop.f32.mrf.mxu1 }
 0x269   : > { %v566_v46 = vmul.f32 0.2, %v552_v39  ;;  %vm562_vm12 = vcmp.gt.f32.partialorder %v552_v39, 0.0 }
 0x26b   : > { %v570_v51 = vsel %vm562_vm12, %v552_v39, %v566_v46 }
 0x270   : > { %v554_v40 = vpop.f32.mrf.mxu1 }
 0x271   : > { %v567_v44 = vmul.f32 0.2, %v554_v40  ;;  %vm563_vm11 = vcmp.gt.f32.partialorder %v554_v40, 0.0 }
 0x273   : > { %v571_v50 = vsel %vm563_vm11, %v554_v40, %v567_v44 }
 0x274   : > { %v578_v52 = vpack.c.bf16 %v571_v50, %v570_v51 }
 0x278   : > { %v557_v41 = vpop.f32.mrf.mxu1 }
 0x279   : > { %v568_v42 = vmul.f32 0.2, %v557_v41  ;;  %vm564_vm9 = vcmp.gt.f32.partialorder %v557_v41, 0.0 }
 0x27b   : > { %v572_v47 = vsel %vm564_vm9, %v557_v41, %v568_v42 }
 0x280   : > { %v559_v43 = vpop.f32.mrf.mxu1 }
 0x281   : > { %vm565_vm10 = vcmp.gt.f32.partialorder %v559_v43, 0.0  ;;  %v569_v45 = vmul.f32 0.2, %v559_v43 }
 0x283   : > { %v573_v48 = vsel %vm565_vm10, %v559_v43, %v569_v45 }
 0x284   : > { %v579_v49 = vpack.c.bf16 %v573_v48, %v572_v47 }
 0x286   : > { %602 = vmatpush.bf16.msra.mxu2 %v579_v49 }
 0x28a   : > { %603 = vmatpush.bf16.msra.mxu2 %v578_v52 }
 0x28d   : > { %782 = vmatmul.msk.bf16.vlgmr.msra.gmra.mxu2 %vm411_vm0, %v794_v53 }
 0x29d   : > { %783 = vmatmul.msk.bf16.gmra.mxu2 %vm411_vm0, %v795_v54 }
 0x310   : > { %v605_v55 = vpop.f32.mrf.mxu2 }
 0x318   : > { %v607_v56 = vpop.f32.mrf.mxu2 }
 0x319   : > { %v799_v57 = vpack.c.bf16 %v607_v56, %v605_v55 }
 0x31b   : > { %800 = vst [vmem:[%s381_s24] sm:$0xff] %v799_v57  }
 0x320   : > { %v610_v58 = vpop.f32.mrf.mxu2 }
 0x328   : > { %v612_v59 = vpop.f32.mrf.mxu2 }
 0x329   : > { %v804_v60 = vpack.c.bf16 %v612_v59, %v610_v58 }
 0x32b   : > { %806 = vst [vmem:[%s381_s24 + $0x8] sm:$0xff] %v804_v60  }
 0x32c   : > { %961 = shalt.err (!%p958_p11)
}
 0x32d   : > { %s1011_s17 = smov 64   ;;  %s1012_s27 = smov 192  }
 0x32e   : > { %s1013_s24 = smov 4  }
 0x32f   : > { %813 = dma.vmem_to_hbm [thread:$0]  (%p1133_p5), %s636_s28, 256, %s638_s18, %s624_s2, %s1011_s17, %s1012_s27, %s1013_s24  }
 0x330 PF: > { %p830_p12 = scmp.ge.s32.totalorder %s1004_s12, 2  ;;  %s652_s21 = sand.u32 1, %s992_s30  }
 0x331   : > { %s653_s19 = scalar_lea.sflag [#allocation4], %s652_s21 }
 0x332   : > { %p824_p13 = pnand %p830_p12, %p1099_p6 }
 0x334   : > { %p825_p0 = pneg %p824_p13 }
 0x336   : > { %987 = dma.done.wait (%p825_p0), %s653_s19, 256  }
 0x337   : > { %989 = vsyncadd (%p825_p0), %s653_s19, 4294967040  ;;  %s1277_s12 = sld [smem:[#allocation12_spill]]  ;;  %s1280_s30 = smov %s996_s10 }
 0x338   : > { %s1278_s14 = sld [smem:[#allocation11_spill]] }
 0x339   : > { %s1279_s11 = sld [smem:[#allocation13_spill]] }
 0x33d   : > { %p23_p3 = scmp.ge.s32.totalorder %s1277_s12, 5  }
 0x33e   : > { %s1281_s10 = smov %s1278_s14 }
 0x33f   :  { %25 = sbr.rel (!%p23_p3) target bundleno = 8 (0x8), region = 108 }
 0x344   :  { %659 = vsyncpa [#allocation3], 1 }
 0x345   :  { %661 = vsyncpa [#allocation3 + $0x1], 1 }
 0x346   :  { %662 = vsyncpa [#allocation6], 1 }
 0x347   :  { %663 = vsyncpa [#allocation4], 1 }
 0x348   :  { %665 = vsyncpa [#allocation4 + $0x1], 1 }

</bundles_post_ra>
